<compile_context>
chip_gen: v7x
topology: tpu7x:2x2x1
jax: 0.10.0
libtpu: 0.0.40
codegen_flags: <defaults>
</compile_context>

<pallas_src>
import math

import jax
import jax.numpy as jnp
from jax import lax
from jax.experimental import pallas as pl
from jax.experimental.pallas import tpu as pltpu

NEG_INF = -1e30  # finite stand-in for -inf; identical softmax result in f32
NL_PAD = 128     # classifier output padded to a full lane width


# ----------------------------------------------------------------------------
# Pallas kernel: dual MHA (CLS query only) + fusion + pooler + classifier
# ----------------------------------------------------------------------------
def _attn_fusion_classify_kernel(mu_ref, xc_ref, x_ref, mask_ref,
                                 wkv_r, bkv_r, wq_r, bq_r, hsel_r, hselt_r,
                                 wf_r, bf_r, wd_r, bd_r, wc_r, bc_r, o_ref):
    bt, S, H = x_ref.shape
    H2 = 2 * H

    x3 = x_ref[...]                                   # (bt, S, H) bf16
    xf = x3.reshape(bt * S, H)                        # S is a multiple of 8

    # Fused K/V projection for BOTH attentions: [K | K_imp | V | V_imp]
    kv = jnp.dot(xf, wkv_r[...], preferred_element_type=jnp.float32) + bkv_r[...]
    k_b = kv[:, :H2].astype(jnp.bfloat16)             # (bt*S, 2H)
    v_b = kv[:, H2:]                                  # (bt*S, 2H) f32

    # CLS-row-only fused Q projection (weights/bias pre-scaled by 1/sqrt(hd))
    q = jnp.dot(xc_ref[...], wq_r[...], preferred_element_type=jnp.float32) + bq_r[...]
    qb = q.astype(jnp.bfloat16)                       # (bt, 2H)

    # Per-head scores, no per-head loop: elementwise q*k, then sum the lanes of
    # each head with a 0/1 head-selector matmul -> (bt, S, 2*num_heads).
    prod = qb[:, None, :] * k_b.reshape(bt, S, H2)    # (bt, S, 2H) bf16
    scores = jnp.dot(prod.reshape(bt * S, H2), hsel_r[...],
                     preferred_element_type=jnp.float32)
    scores = scores.reshape(bt, S, -1) + mask_ref[...]   # additive key mask
                                                          # (0 on plain heads)

    # Softmax over the key axis (axis=1), f32; divide goes to the EUP.
    m = jnp.max(scores, axis=1, keepdims=True)
    e = jnp.exp(scores - m)
    p = e * pl.reciprocal(jnp.sum(e, axis=1, keepdims=True), approx=True)

    # Context: expand per-head probs back onto the H lanes, weight V, reduce.
    pexp = jnp.dot(p.reshape(bt * S, -1).astype(jnp.bfloat16), hselt_r[...],
                   preferred_element_type=jnp.float32)          # (bt*S, 2H)
    ctx = jnp.sum((pexp * v_b).reshape(bt, S, H2), axis=1)      # (bt, 2H)

    # mu-weighted fusion + fusion_linear + tanh (CLS rows only)
    mu = mu_ref[0]
    fused = mu * ctx[:, :H] + (1.0 - mu) * ctx[:, H:]
    fused = jnp.tanh(jnp.dot(fused.astype(jnp.bfloat16), wf_r[...],
                             preferred_element_type=jnp.float32) + bf_r[...])
    # pooler (dense + tanh); dropout == identity at inference
    pooled = jnp.tanh(jnp.dot(fused.astype(jnp.bfloat16), wd_r[...],
                              preferred_element_type=jnp.float32) + bd_r[...])
    # classifier, padded to 128 output lanes for an unmasked lane-dense store
    o_ref[...] = jnp.dot(pooled.astype(jnp.bfloat16), wc_r[...],
                         preferred_element_type=jnp.float32) + bc_r[...]


def attention_fusion_classify(hrm, key_mask, P, num_heads, num_labels):
    B, S, H = hrm.shape
    hd = H // num_heads
    scale = 1.0 / math.sqrt(hd)
    nh2 = 2 * num_heads
    f32, bf16 = jnp.float32, jnp.bfloat16

    # Batch rows per grid step: >=8 fills f32 sublanes; keep bt == B or bt % 8 == 0
    # so 2-D block shapes satisfy the (8,128) layout rule.  For very large S*H
    # (real BERT) lower bt / tile S so bt*S*(6H) intermediates fit VMEM.
    bt = 8 if B % 8 == 0 else B
    grid = (B // bt,)

    # ---- host-side weight packing -------------------------------------------
    wq_all = (jnp.concatenate([P["Wq"], P["Wq_imp"]], axis=1) * scale).astype(bf16)
    bq_all = (jnp.concatenate([P["bq"], P["bq_imp"]], axis=1) * scale).astype(f32)
    wkv_all = jnp.concatenate([P["Wk"], P["Wk_imp"], P["Wv"], P["Wv_imp"]],
                              axis=1).astype(bf16)                      # (H, 4H)
    bkv_all = jnp.concatenate([P["bk"], P["bk_imp"], P["bv"], P["bv_imp"]],
                              axis=1).astype(f32)                       # (1, 4H)
    wc_pad = jnp.zeros((H, NL_PAD), f32).at[:, :num_labels].set(P["Wc"]).astype(bf16)
    bc_pad = jnp.zeros((1, NL_PAD), f32).at[:, :num_labels].set(P["bc"])

    lane_head = jnp.arange(2 * H) // hd                                  # lane -> head id
    hsel = (lane_head[:, None] == jnp.arange(nh2)[None, :]).astype(bf16)  # (2H, 2NH)
    hsel_t = jnp.transpose(hsel)                                          # (2NH, 2H)

    # additive key mask only on the importance-attention heads (NH..2NH-1)
    sel = (jnp.arange(nh2) >= num_heads).astype(f32)
    add_mask = key_mask.astype(f32)[:, :, None] * sel                     # (B, S, 2NH)

    mu_arr = jnp.reshape(P["mu"].astype(f32), (1,))
    xc = hrm[:, 0, :].astype(bf16)                                        # CLS rows (B, H)
    x_b = hrm.astype(bf16)                                                # (B, S, H)

    weights = [wkv_all, bkv_all, wq_all, bq_all, hsel, hsel_t,
               P["Wf"].astype(bf16), P["bf"].astype(f32),
               P["Wd"].astype(bf16), P["bd"].astype(f32),
               wc_pad, bc_pad]

    def const_spec(arr):
        nd = arr.ndim
        return pl.BlockSpec(arr.shape, lambda b, nd=nd: (0,) * nd)

    out = pl.pallas_call(
        _attn_fusion_classify_kernel,
        out_shape=jax.ShapeDtypeStruct((B, NL_PAD), jnp.float32),
        grid=grid,
        in_specs=[pl.BlockSpec(memory_space=pltpu.MemorySpace.SMEM),    # mu scalar
                  pl.BlockSpec((bt, H), lambda b: (b, 0)),              # CLS rows
                  pl.BlockSpec((bt, S, H), lambda b: (b, 0, 0)),        # hidden mix
                  pl.BlockSpec((bt, S, nh2), lambda b: (b, 0, 0))]      # key mask
                 + [const_spec(w) for w in weights],
        out_specs=pl.BlockSpec((bt, NL_PAD), lambda b: (b, 0)),
        compiler_params=pltpu.CompilerParams(
            dimension_semantics=("parallel",),
            vmem_limit_bytes=64 * 1024 * 1024),   # keep <= physical (64 MiB on v7x)
    )(mu_arr, xc, x_b, add_mask, *weights)
    return out[:, :num_labels]


# ----------------------------------------------------------------------------
# Plain-JAX glue: data-dependent word-span processing (vectorized)
# ----------------------------------------------------------------------------
def word_mix_preprocess(seq_out, word_index, word_emb, mix_lambda):
    """get_char_word_cosine_similarity + hidden_representation_add_word_embedding
    + get_hidden_representation_mix_and_attention_mask (non-overlapping spans)."""
    B, S, H = seq_out.shape
    start = word_index[..., 0]                                   # (B, W)
    end = word_index[..., 1]
    nonzero = jnp.logical_not((start == 0) & (end == 0))
    valid = jnp.cumprod(nonzero.astype(jnp.int32), axis=1) > 0   # "break" at first (0,0)

    t = jnp.arange(S)[None, None, :]
    span = (t >= start[..., None]) & (t < end[..., None]) & valid[..., None]   # (B,W,S)

    xn = seq_out / jnp.linalg.norm(seq_out, axis=-1, keepdims=True)
    wn = word_emb / jnp.linalg.norm(word_emb, axis=-1, keepdims=True)
    cs = jnp.einsum('bsh,bwh->bws', xn, wn)                      # cosine sims (B,W,S)
    cs_masked = jnp.where(span, cs, NEG_INF)

    # softmax of cosine sims over each span; add word embedding to span chars
    mx = jnp.max(cs_masked, axis=-1, keepdims=True)
    e = jnp.where(span, jnp.exp(cs - mx), 0.0)
    denom = jnp.sum(e, axis=-1, keepdims=True)
    p = jnp.where(denom > 0.0, e / jnp.maximum(denom, 1e-30), 0.0)
    x_new = seq_out + jnp.einsum('bws,bwh->bsh', p, word_emb)

    # hidden-representation mix + importance key mask
    f_lambda = jnp.exp(mix_lambda - 1.0)
    Lf = (end - start).astype(jnp.float32)
    multi = valid & ((end - start) > 1)
    single = valid & ((end - start) == 1)
    mic_abs = jnp.argmax(cs_masked, axis=-1)                     # most-important char (absolute)
    alpha = jnp.where(multi, (1.0 - f_lambda) / jnp.maximum(Lf - 1.0, 1.0), 0.0)

    is_mic = multi[..., None] & (t == mic_abs[..., None])        # (B,W,S)
    is_single_start = single[..., None] & (t == start[..., None])
    important = jnp.any(is_mic | is_single_start, axis=1)        # (B,S)
    key_mask = jnp.where(important, 0.0, NEG_INF)

    is_mic_f = is_mic.astype(jnp.float32)
    span_f = span.astype(jnp.float32)
    multi_f = multi.astype(jnp.float32)[..., None]
    x_mic = jnp.einsum('bws,bsh->bwh', is_mic_f, x_new)
    sum_span = jnp.einsum('bws,bsh->bwh', span_f, x_new)

    cnm = span_f * multi_f * (1.0 - is_mic_f)                    # non-mic chars of multi-char words
    coef_nm = jnp.einsum('bws,bw->bs', cnm, 1.0 - alpha)
    term_nm = jnp.einsum('bws,bw,bwh->bsh', cnm, alpha, x_mic)
    coef_m = jnp.einsum('bws,bw->bs', is_mic_f, f_lambda - alpha)
    term_m = jnp.einsum('bws,bw,bwh->bsh', is_mic_f, alpha, sum_span)
    covered = jnp.einsum('bws->bs', span_f * multi_f) > 0.0

    mixed = (coef_nm + coef_m)[..., None] * x_new + term_nm + term_m
    hrm = jnp.where(covered[..., None], mixed, x_new)
    return hrm, key_mask


def ptm_hrmf_forward(P, input_ids, attention_mask, token_type_ids, word_index, word_ids,
                     *, num_heads, num_labels):
    del attention_mask, token_type_ids  # consumed only by the (stand-in) encoder
    # TODO(synk): pretrained BERT encoder replaced by deterministic embedding lookup.
    seq_out = P["bert_embedding"][input_ids]                     # (B, S, H)

    we = P["word_table"][word_ids]                               # frozen word2vec stand-in (B,W,E)
    we = jnp.tanh(we @ P["Wt"] + P["bt"])                        # dim_transform + tanh
    we = we @ P["Wr"] + P["br"]                                  # dim_retain

    hrm, key_mask = word_mix_preprocess(seq_out, word_index, we, P["mix_lambda"])
    return attention_fusion_classify(hrm, key_mask, P, num_heads, num_labels)


# ----------------------------------------------------------------------------
# Parameter init (deterministic) and pure-JAX reference of the kernel portion
# ----------------------------------------------------------------------------
def init_params(key, vocab, wvocab, E, H, num_labels):
    ks = jax.random.split(key, 14)
    P = {}

    def lin(k, fi, fo):
        return jax.random.normal(k, (fi, fo), jnp.float32) * (1.0 / math.sqrt(fi))

    P["bert_embedding"] = jax.random.normal(ks[0], (vocab, H), jnp.float32) * 0.5
    wt = jax.random.normal(ks[1], (wvocab, E), jnp.float32) * 0.5
    P["word_table"] = jnp.concatenate([wt, jnp.zeros((1, E), jnp.float32)], axis=0)
    P["Wt"] = lin(ks[2], E, H); P["bt"] = jnp.full((H,), 0.01, jnp.float32)
    P["Wr"] = lin(ks[3], H, H); P["br"] = jnp.full((H,), 0.02, jnp.float32)

    names_fi_fo = [("q", H, H), ("k", H, H), ("v", H, H),
                   ("q_imp", H, H), ("k_imp", H, H), ("v_imp", H, H),
                   ("f", H, H), ("d", H, H), ("c", H, num_labels)]
    for i, (n, fi, fo) in enumerate(names_fi_fo):
        P["W" + n] = lin(ks[4 + i], fi, fo)
        P["b" + n] = jnp.full((1, fo), 0.01 * (i + 1), jnp.float32)

    P["mix_lambda"] = jnp.asarray(0.5, jnp.float32)
    P["mu"] = jnp.asarray(0.6, jnp.float32)
    return P


def attention_fusion_classify_ref(hrm, key_mask, P, num_heads):
    """Pure-JAX reference (full S x S attention); weights/activations rounded to
    bf16 the same way the kernel ingests them, math in f32."""
    def _bf(a):
        return a.astype(jnp.bfloat16).astype(jnp.float32)

    B, S, H = hrm.shape
    hd = H // num_heads
    x = _bf(hrm)

    def mha(wq, bq, wk, bk, wv, bv, m):
        q = (x @ _bf(wq) + bq).reshape(B, S, num_heads, hd).transpose(0, 2, 1, 3)
        k = (x @ _bf(wk) + bk).reshape(B, S, num_heads, hd).transpose(0, 2, 1, 3)
        v = (x @ _bf(wv) + bv).reshape(B, S, num_heads, hd).transpose(0, 2, 1, 3)
        s = jnp.einsum('bhqd,bhkd->bhqk', q, k) / math.sqrt(hd)
        if m is not None:
            s = s + m[:, None, None, :]
        p = jax.nn.softmax(s, axis=-1)
        return jnp.einsum('bhqk,bhkd->bhqd', p, v).transpose(0, 2, 1, 3).reshape(B, S, H)

    c1 = mha(P["Wq"], P["bq"], P["Wk"], P["bk"], P["Wv"], P["bv"], None)
    c2 = mha(P["Wq_imp"], P["bq_imp"], P["Wk_imp"], P["bk_imp"],
             P["Wv_imp"], P["bv_imp"], key_mask)
    fused = jnp.tanh((P["mu"] * c1 + (1.0 - P["mu"]) * c2) @ _bf(P["Wf"]) + P["bf"])
    pooled = jnp.tanh(fused[:, 0] @ _bf(P["Wd"]) + P["bd"])
    return pooled @ _bf(P["Wc"]) + P["bc"]


# ----------------------------------------------------------------------------
if __name__ == "__main__":
    B, S, H, NH, E, W, NL = 2, 8, 32, 4, 16, 3, 3
    VOCAB, WVOCAB = 50, 30

    key = jax.random.PRNGKey(0)
    kp, kids = jax.random.split(key)
    P = init_params(kp, VOCAB, WVOCAB, E, H, NL)

    input_ids = jax.random.randint(kids, (B, S), 0, VOCAB, dtype=jnp.int32)
    attention_mask = jnp.ones((B, S), jnp.int32)
    token_type_ids = jnp.zeros((B, S), jnp.int32)
    word_ids = jnp.array([[3, 7, WVOCAB], [1, 5, WVOCAB]], dtype=jnp.int32)
    word_index = jnp.array([[[1, 4], [5, 6], [0, 0]],
                            [[2, 3], [4, 7], [0, 0]]], dtype=jnp.int32)  # (start, end) spans

    logits = ptm_hrmf_forward(P, input_ids, attention_mask, token_type_ids,
                              word_index, word_ids, num_heads=NH, num_labels=NL)
    logits = jax.block_until_ready(logits)
    assert logits.shape == (B, NL)

    # validate the Pallas-covered portion against a pure-JAX reference
    seq_out = P["bert_embedding"][input_ids]
    we = P["word_table"][word_ids]
    we = jnp.tanh(we @ P["Wt"] + P["bt"]) @ P["Wr"] + P["br"]
    hrm, key_mask = word_mix_preprocess(seq_out, word_index, we, P["mix_lambda"])
    ref = attention_fusion_classify_ref(hrm, key_mask, P, NH)
    assert jnp.allclose(logits, ref, atol=2e-2, rtol=2e-2), (logits, ref)

    print("KERNEL_OK")
</pallas_src>

<mosaic_0001>
module attributes {stable_mosaic.version = 11 : i64} {
  func.func @_attn_fusion_classify_kernel(%arg0: i32, %arg1: memref<1xf32, #tpu.memory_space<smem>>, %arg2: memref<2x32xbf16, #tpu.memory_space<vmem>>, %arg3: memref<2x8x32xbf16, #tpu.memory_space<vmem>>, %arg4: memref<2x8x8xf32, #tpu.memory_space<vmem>>, %arg5: memref<32x128xbf16, #tpu.memory_space<vmem>>, %arg6: memref<1x128xf32, #tpu.memory_space<vmem>>, %arg7: memref<32x64xbf16, #tpu.memory_space<vmem>>, %arg8: memref<1x64xf32, #tpu.memory_space<vmem>>, %arg9: memref<64x8xbf16, #tpu.memory_space<vmem>>, %arg10: memref<8x64xbf16, #tpu.memory_space<vmem>>, %arg11: memref<32x32xbf16, #tpu.memory_space<vmem>>, %arg12: memref<1x32xf32, #tpu.memory_space<vmem>>, %arg13: memref<32x32xbf16, #tpu.memory_space<vmem>>, %arg14: memref<1x32xf32, #tpu.memory_space<vmem>>, %arg15: memref<32x128xbf16, #tpu.memory_space<vmem>>, %arg16: memref<1x128xf32, #tpu.memory_space<vmem>>, %arg17: memref<2x128xf32, #tpu.memory_space<vmem>>) attributes {dimension_semantics = [#tpu.dimension_semantics<parallel>], iteration_bounds = array<i64: 1>, scalar_prefetch = 0 : i64, scratch_operands = 0 : i64, tpu.core_type = #tpu.core_type<tc>, window_params = [{transform_indices = @transform_0, window_bounds = array<i64: 1>}, {transform_indices = @transform_1, window_bounds = array<i64: 2, 32>}, {transform_indices = @transform_2, window_bounds = array<i64: 2, 8, 32>}, {transform_indices = @transform_3, window_bounds = array<i64: 2, 8, 8>}, {pipeline_mode = #tpu.pipeline_mode<synchronous>, transform_indices = @transform_4, window_bounds = array<i64: 32, 128>}, {pipeline_mode = #tpu.pipeline_mode<synchronous>, transform_indices = @transform_5, window_bounds = array<i64: 1, 128>}, {pipeline_mode = #tpu.pipeline_mode<synchronous>, transform_indices = @transform_6, window_bounds = array<i64: 32, 64>}, {pipeline_mode = #tpu.pipeline_mode<synchronous>, transform_indices = @transform_7, window_bounds = array<i64: 1, 64>}, {pipeline_mode = #tpu.pipeline_mode<synchronous>, transform_indices = @transform_8, window_bounds = array<i64: 64, 8>}, {pipeline_mode = #tpu.pipeline_mode<synchronous>, transform_indices = @transform_9, window_bounds = array<i64: 8, 64>}, {pipeline_mode = #tpu.pipeline_mode<synchronous>, transform_indices = @transform_10, window_bounds = array<i64: 32, 32>}, {pipeline_mode = #tpu.pipeline_mode<synchronous>, transform_indices = @transform_11, window_bounds = array<i64: 1, 32>}, {pipeline_mode = #tpu.pipeline_mode<synchronous>, transform_indices = @transform_12, window_bounds = array<i64: 32, 32>}, {pipeline_mode = #tpu.pipeline_mode<synchronous>, transform_indices = @transform_13, window_bounds = array<i64: 1, 32>}, {pipeline_mode = #tpu.pipeline_mode<synchronous>, transform_indices = @transform_14, window_bounds = array<i64: 32, 128>}, {pipeline_mode = #tpu.pipeline_mode<synchronous>, transform_indices = @transform_15, window_bounds = array<i64: 1, 128>}, {transform_indices = @transform_16, window_bounds = array<i64: 2, 128>}]} {
    %c0 = arith.constant 0 : index
    %c0_0 = arith.constant 0 : index
    %c0_1 = arith.constant 0 : index
    %0 = vector.load %arg3[%c0, %c0_0, %c0_1] : memref<2x8x32xbf16, #tpu.memory_space<vmem>>, vector<2x8x32xbf16>
    %1 = vector.shape_cast %0 : vector<2x8x32xbf16> to vector<16x32xbf16>
    %c0_2 = arith.constant 0 : index
    %c0_3 = arith.constant 0 : index
    %2 = vector.load %arg5[%c0_2, %c0_3] : memref<32x128xbf16, #tpu.memory_space<vmem>>, vector<32x128xbf16>
    %cst = arith.constant dense<0.000000e+00> : vector<16x128xf32>
    %3 = tpu.matmul %1, %2, %cst {dimension_numbers = #tpu.dot_dimension_numbers<[1], [0], [0], [1], [0, 0, 1, 1], [], []>} : vector<16x32xbf16>, vector<32x128xbf16>, vector<16x128xf32> -> vector<16x128xf32>
    %c0_4 = arith.constant 0 : index
    %c0_5 = arith.constant 0 : index
    %4 = vector.load %arg6[%c0_4, %c0_5] : memref<1x128xf32, #tpu.memory_space<vmem>>, vector<1x128xf32>
    %5 = vector.broadcast %4 : vector<1x128xf32> to vector<16x128xf32>
    %6 = arith.addf %3, %5 : vector<16x128xf32>
    %7 = vector.extract_strided_slice %6 {offsets = [0, 0], sizes = [16, 64], strides = [1, 1]} : vector<16x128xf32> to vector<16x64xf32>
    %8 = arith.truncf %7 : vector<16x64xf32> to vector<16x64xbf16>
    %9 = vector.extract_strided_slice %6 {offsets = [0, 64], sizes = [16, 64], strides = [1, 1]} : vector<16x128xf32> to vector<16x64xf32>
    %c0_6 = arith.constant 0 : index
    %c0_7 = arith.constant 0 : index
    %10 = vector.load %arg2[%c0_6, %c0_7] : memref<2x32xbf16, #tpu.memory_space<vmem>>, vector<2x32xbf16>
    %c0_8 = arith.constant 0 : index
    %c0_9 = arith.constant 0 : index
    %11 = vector.load %arg7[%c0_8, %c0_9] : memref<32x64xbf16, #tpu.memory_space<vmem>>, vector<32x64xbf16>
    %cst_10 = arith.constant dense<0.000000e+00> : vector<2x64xf32>
    %12 = tpu.matmul %10, %11, %cst_10 {dimension_numbers = #tpu.dot_dimension_numbers<[1], [0], [0], [1], [0, 0, 1, 1], [], []>} : vector<2x32xbf16>, vector<32x64xbf16>, vector<2x64xf32> -> vector<2x64xf32>
    %c0_11 = arith.constant 0 : index
    %c0_12 = arith.constant 0 : index
    %13 = vector.load %arg8[%c0_11, %c0_12] : memref<1x64xf32, #tpu.memory_space<vmem>>, vector<1x64xf32>
    %14 = vector.broadcast %13 : vector<1x64xf32> to vector<2x64xf32>
    %15 = arith.addf %12, %14 : vector<2x64xf32>
    %16 = arith.truncf %15 : vector<2x64xf32> to vector<2x64xbf16>
    %17 = vector.shape_cast %16 : vector<2x64xbf16> to vector<2x1x64xbf16>
    %18 = vector.shape_cast %8 : vector<16x64xbf16> to vector<2x8x64xbf16>
    %19 = vector.broadcast %17 : vector<2x1x64xbf16> to vector<2x8x64xbf16>
    %20 = arith.mulf %19, %18 : vector<2x8x64xbf16>
    %21 = vector.shape_cast %20 : vector<2x8x64xbf16> to vector<16x64xbf16>
    %c0_13 = arith.constant 0 : index
    %c0_14 = arith.constant 0 : index
    %22 = vector.load %arg9[%c0_13, %c0_14] : memref<64x8xbf16, #tpu.memory_space<vmem>>, vector<64x8xbf16>
    %cst_15 = arith.constant dense<0.000000e+00> : vector<16x8xf32>
    %23 = tpu.matmul %21, %22, %cst_15 {dimension_numbers = #tpu.dot_dimension_numbers<[1], [0], [0], [1], [0, 0, 1, 1], [], []>} : vector<16x64xbf16>, vector<64x8xbf16>, vector<16x8xf32> -> vector<16x8xf32>
    %24 = vector.shape_cast %23 : vector<16x8xf32> to vector<2x8x8xf32>
    %c0_16 = arith.constant 0 : index
    %c0_17 = arith.constant 0 : index
    %c0_18 = arith.constant 0 : index
    %25 = vector.load %arg4[%c0_16, %c0_17, %c0_18] : memref<2x8x8xf32, #tpu.memory_space<vmem>>, vector<2x8x8xf32>
    %26 = arith.addf %24, %25 : vector<2x8x8xf32>
    %cst_19 = arith.constant dense<0xFF800000> : vector<2x8xf32>
    %27 = vector.multi_reduction <maximumf>, %26, %cst_19 [1] : vector<2x8x8xf32> to vector<2x8xf32>
    %28 = vector.shape_cast %27 : vector<2x8xf32> to vector<2x1x8xf32>
    %29 = vector.broadcast %28 : vector<2x1x8xf32> to vector<2x8x8xf32>
    %30 = arith.subf %26, %29 : vector<2x8x8xf32>
    %31 = math.exp %30 : vector<2x8x8xf32>
    %cst_20 = arith.constant dense<0.000000e+00> : vector<2x8xf32>
    %32 = vector.multi_reduction <add>, %31, %cst_20 [1] : vector<2x8x8xf32> to vector<2x8xf32>
    %33 = vector.shape_cast %32 : vector<2x8xf32> to vector<2x1x8xf32>
    %34 = tpu.reciprocal %33 {approx = true} : vector<2x1x8xf32> -> vector<2x1x8xf32>
    %35 = vector.broadcast %34 : vector<2x1x8xf32> to vector<2x8x8xf32>
    %36 = arith.mulf %31, %35 : vector<2x8x8xf32>
    %37 = vector.shape_cast %36 : vector<2x8x8xf32> to vector<16x8xf32>
    %38 = arith.truncf %37 : vector<16x8xf32> to vector<16x8xbf16>
    %c0_21 = arith.constant 0 : index
    %c0_22 = arith.constant 0 : index
    %39 = vector.load %arg10[%c0_21, %c0_22] : memref<8x64xbf16, #tpu.memory_space<vmem>>, vector<8x64xbf16>
    %cst_23 = arith.constant dense<0.000000e+00> : vector<16x64xf32>
    %40 = tpu.matmul %38, %39, %cst_23 {dimension_numbers = #tpu.dot_dimension_numbers<[1], [0], [0], [1], [0, 0, 1, 1], [], []>} : vector<16x8xbf16>, vector<8x64xbf16>, vector<16x64xf32> -> vector<16x64xf32>
    %41 = arith.mulf %40, %9 : vector<16x64xf32>
    %42 = vector.shape_cast %41 : vector<16x64xf32> to vector<2x8x64xf32>
    %cst_24 = arith.constant dense<0.000000e+00> : vector<2x64xf32>
    %43 = vector.multi_reduction <add>, %42, %cst_24 [1] : vector<2x8x64xf32> to vector<2x64xf32>
    %c0_25 = arith.constant 0 : index
    %44 = memref.load %arg1[%c0_25] : memref<1xf32, #tpu.memory_space<smem>>
    %45 = vector.extract_strided_slice %43 {offsets = [0, 0], sizes = [2, 32], strides = [1, 1]} : vector<2x64xf32> to vector<2x32xf32>
    %46 = vector.broadcast %44 : f32 to vector<2x32xf32>
    %47 = arith.mulf %46, %45 : vector<2x32xf32>
    %cst_26 = arith.constant 1.000000e+00 : f32
    %48 = arith.subf %cst_26, %44 : f32
    %49 = vector.extract_strided_slice %43 {offsets = [0, 32], sizes = [2, 32], strides = [1, 1]} : vector<2x64xf32> to vector<2x32xf32>
    %50 = vector.broadcast %48 : f32 to vector<2x32xf32>
    %51 = arith.mulf %50, %49 : vector<2x32xf32>
    %52 = arith.addf %47, %51 : vector<2x32xf32>
    %53 = arith.truncf %52 : vector<2x32xf32> to vector<2x32xbf16>
    %c0_27 = arith.constant 0 : index
    %c0_28 = arith.constant 0 : index
    %54 = vector.load %arg11[%c0_27, %c0_28] : memref<32x32xbf16, #tpu.memory_space<vmem>>, vector<32x32xbf16>
    %cst_29 = arith.constant dense<0.000000e+00> : vector<2x32xf32>
    %55 = tpu.matmul %53, %54, %cst_29 {dimension_numbers = #tpu.dot_dimension_numbers<[1], [0], [0], [1], [0, 0, 1, 1], [], []>} : vector<2x32xbf16>, vector<32x32xbf16>, vector<2x32xf32> -> vector<2x32xf32>
    %c0_30 = arith.constant 0 : index
    %c0_31 = arith.constant 0 : index
    %56 = vector.load %arg12[%c0_30, %c0_31] : memref<1x32xf32, #tpu.memory_space<vmem>>, vector<1x32xf32>
    %57 = vector.broadcast %56 : vector<1x32xf32> to vector<2x32xf32>
    %58 = arith.addf %55, %57 : vector<2x32xf32>
    %59 = math.tanh %58 : vector<2x32xf32>
    %60 = arith.truncf %59 : vector<2x32xf32> to vector<2x32xbf16>
    %c0_32 = arith.constant 0 : index
    %c0_33 = arith.constant 0 : index
    %61 = vector.load %arg13[%c0_32, %c0_33] : memref<32x32xbf16, #tpu.memory_space<vmem>>, vector<32x32xbf16>
    %cst_34 = arith.constant dense<0.000000e+00> : vector<2x32xf32>
    %62 = tpu.matmul %60, %61, %cst_34 {dimension_numbers = #tpu.dot_dimension_numbers<[1], [0], [0], [1], [0, 0, 1, 1], [], []>} : vector<2x32xbf16>, vector<32x32xbf16>, vector<2x32xf32> -> vector<2x32xf32>
    %c0_35 = arith.constant 0 : index
    %c0_36 = arith.constant 0 : index
    %63 = vector.load %arg14[%c0_35, %c0_36] : memref<1x32xf32, #tpu.memory_space<vmem>>, vector<1x32xf32>
    %64 = vector.broadcast %63 : vector<1x32xf32> to vector<2x32xf32>
    %65 = arith.addf %62, %64 : vector<2x32xf32>
    %66 = math.tanh %65 : vector<2x32xf32>
    %67 = arith.truncf %66 : vector<2x32xf32> to vector<2x32xbf16>
    %c0_37 = arith.constant 0 : index
    %c0_38 = arith.constant 0 : index
    %68 = vector.load %arg15[%c0_37, %c0_38] : memref<32x128xbf16, #tpu.memory_space<vmem>>, vector<32x128xbf16>
    %cst_39 = arith.constant dense<0.000000e+00> : vector<2x128xf32>
    %69 = tpu.matmul %67, %68, %cst_39 {dimension_numbers = #tpu.dot_dimension_numbers<[1], [0], [0], [1], [0, 0, 1, 1], [], []>} : vector<2x32xbf16>, vector<32x128xbf16>, vector<2x128xf32> -> vector<2x128xf32>
    %c0_40 = arith.constant 0 : index
    %c0_41 = arith.constant 0 : index
    %70 = vector.load %arg16[%c0_40, %c0_41] : memref<1x128xf32, #tpu.memory_space<vmem>>, vector<1x128xf32>
    %71 = vector.broadcast %70 : vector<1x128xf32> to vector<2x128xf32>
    %72 = arith.addf %69, %71 : vector<2x128xf32>
    %c0_42 = arith.constant 0 : index
    %c0_43 = arith.constant 0 : index
    %73 = vector.load %arg17[%c0_42, %c0_43] : memref<2x128xf32, #tpu.memory_space<vmem>>, vector<2x128xf32>
    tpu.vector_store %arg17[%c0_42, %c0_43], %72 {strides = array<i32>} : memref<2x128xf32, #tpu.memory_space<vmem>>, vector<2x128xf32>,
    return
  }
  func.func @transform_0(%arg0: i32) -> i32 {
    %c0_i32 = arith.constant 0 : i32
    %c0_i32_0 = arith.constant 0 : i32
    return %c0_i32 : i32
  }
  func.func @transform_1(%arg0: i32) -> (i32, i32) {
    %c0_i32 = arith.constant 0 : i32
    %c0_i32_0 = arith.constant 0 : i32
    return %arg0, %c0_i32 : i32, i32
  }
  func.func @transform_2(%arg0: i32) -> (i32, i32, i32) {
    %c0_i32 = arith.constant 0 : i32
    %c0_i32_0 = arith.constant 0 : i32
    %c0_i32_1 = arith.constant 0 : i32
    return %arg0, %c0_i32, %c0_i32_0 : i32, i32, i32
  }
  func.func @transform_3(%arg0: i32) -> (i32, i32, i32) {
    %c0_i32 = arith.constant 0 : i32
    %c0_i32_0 = arith.constant 0 : i32
    %c0_i32_1 = arith.constant 0 : i32
    return %arg0, %c0_i32, %c0_i32_0 : i32, i32, i32
  }
  func.func @transform_4(%arg0: i32) -> (i32, i32) {
    %c0_i32 = arith.constant 0 : i32
    %c0_i32_0 = arith.constant 0 : i32
    %c0_i32_1 = arith.constant 0 : i32
    return %c0_i32, %c0_i32_0 : i32, i32
  }
  func.func @transform_5(%arg0: i32) -> (i32, i32) {
    %c0_i32 = arith.constant 0 : i32
    %c0_i32_0 = arith.constant 0 : i32
    %c0_i32_1 = arith.constant 0 : i32
    return %c0_i32, %c0_i32_0 : i32, i32
  }
  func.func @transform_6(%arg0: i32) -> (i32, i32) {
    %c0_i32 = arith.constant 0 : i32
    %c0_i32_0 = arith.constant 0 : i32
    %c0_i32_1 = arith.constant 0 : i32
    return %c0_i32, %c0_i32_0 : i32, i32
  }
  func.func @transform_7(%arg0: i32) -> (i32, i32) {
    %c0_i32 = arith.constant 0 : i32
    %c0_i32_0 = arith.constant 0 : i32
    %c0_i32_1 = arith.constant 0 : i32
    return %c0_i32, %c0_i32_0 : i32, i32
  }
  func.func @transform_8(%arg0: i32) -> (i32, i32) {
    %c0_i32 = arith.constant 0 : i32
    %c0_i32_0 = arith.constant 0 : i32
    %c0_i32_1 = arith.constant 0 : i32
    return %c0_i32, %c0_i32_0 : i32, i32
  }
  func.func @transform_9(%arg0: i32) -> (i32, i32) {
    %c0_i32 = arith.constant 0 : i32
    %c0_i32_0 = arith.constant 0 : i32
    %c0_i32_1 = arith.constant 0 : i32
    return %c0_i32, %c0_i32_0 : i32, i32
  }
  func.func @transform_10(%arg0: i32) -> (i32, i32) {
    %c0_i32 = arith.constant 0 : i32
    %c0_i32_0 = arith.constant 0 : i32
    %c0_i32_1 = arith.constant 0 : i32
    return %c0_i32, %c0_i32_0 : i32, i32
  }
  func.func @transform_11(%arg0: i32) -> (i32, i32) {
    %c0_i32 = arith.constant 0 : i32
    %c0_i32_0 = arith.constant 0 : i32
    %c0_i32_1 = arith.constant 0 : i32
    return %c0_i32, %c0_i32_0 : i32, i32
  }
  func.func @transform_12(%arg0: i32) -> (i32, i32) {
    %c0_i32 = arith.constant 0 : i32
    %c0_i32_0 = arith.constant 0 : i32
    %c0_i32_1 = arith.constant 0 : i32
    return %c0_i32, %c0_i32_0 : i32, i32
  }
  func.func @transform_13(%arg0: i32) -> (i32, i32) {
    %c0_i32 = arith.constant 0 : i32
    %c0_i32_0 = arith.constant 0 : i32
    %c0_i32_1 = arith.constant 0 : i32
    return %c0_i32, %c0_i32_0 : i32, i32
  }
  func.func @transform_14(%arg0: i32) -> (i32, i32) {
    %c0_i32 = arith.constant 0 : i32
    %c0_i32_0 = arith.constant 0 : i32
    %c0_i32_1 = arith.constant 0 : i32
    return %c0_i32, %c0_i32_0 : i32, i32
  }
  func.func @transform_15(%arg0: i32) -> (i32, i32) {
    %c0_i32 = arith.constant 0 : i32
    %c0_i32_0 = arith.constant 0 : i32
    %c0_i32_1 = arith.constant 0 : i32
    return %c0_i32, %c0_i32_0 : i32, i32
  }
  func.func @transform_16(%arg0: i32) -> (i32, i32) {
    %c0_i32 = arith.constant 0 : i32
    %c0_i32_0 = arith.constant 0 : i32
    return %arg0, %c0_i32 : i32, i32
  }
}

</mosaic_0001>

<bundles_post_ra>
// kernel: tpu_custom_call.1
= control target key start
LH: loop header
LB: loop body
LE: loop exit
PB: predicated region body
PF: predicated region fallthrough
CT: control target
= control target key end

     0   :  { %s1797_s0 = inlined_call_operand.<no memory space> [shape: f32[1], index: 0, kind: input, shape index: {}]   ;;  %s1798_s1 = inlined_call_operand.hbm [shape: bf16[2,32], index: 1, kind: input, shape index: {}]   ;;  %s1799_s2 = inlined_call_operand.hbm [shape: bf16[2,8,32], index: 2, kind: input, shape index: {}]   ;;  %s1800_s3 = inlined_call_operand.hbm [shape: f32[2,8,8], index: 3, kind: input, shape index: {}]   ;;  %s1801_s4 = inlined_call_operand.hbm [shape: bf16[32,128], index: 4, kind: input, shape index: {}]   ;;  %s1802_s5 = inlined_call_operand.hbm [shape: f32[1,128], index: 5, kind: input, shape index: {}]   ;;  %s1803_s6 = inlined_call_operand.hbm [shape: bf16[32,64], index: 6, kind: input, shape index: {}]   ;;  %s1804_s7 = inlined_call_operand.hbm [shape: f32[1,64], index: 7, kind: input, shape index: {}]   ;;  %s1805_s8 = inlined_call_operand.hbm [shape: bf16[64,8], index: 8, kind: input, shape index: {}]   ;;  %s1806_s9 = inlined_call_operand.hbm [shape: bf16[8,64], index: 9, kind: input, shape index: {}]   ;;  %s1807_s10 = inlined_call_operand.hbm [shape: bf16[32,32], index: 10, kind: input, shape index: {}]   ;;  %s1808_s11 = inlined_call_operand.hbm [shape: f32[1,32], index: 11, kind: input, shape index: {}]   ;;  %s1809_s12 = inlined_call_operand.hbm [shape: bf16[32,32], index: 12, kind: input, shape index: {}]   ;;  %s1810_s13 = inlined_call_operand.hbm [shape: f32[1,32], index: 13, kind: input, shape index: {}]   ;;  %s1811_s14 = inlined_call_operand.hbm [shape: bf16[32,128], index: 14, kind: input, shape index: {}]   ;;  %s1812_s15 = inlined_call_operand.hbm [shape: f32[1,128], index: 15, kind: input, shape index: {}]   ;;  %s1813_s16 = inlined_call_operand.hbm [shape: f32[2,128], index: 16, kind: output, shape index: {}]  }
   0x1   :  { %1816 = sst [smem:[#allocation37_spill]] %s1797_s0 }
   0x2   :  { %1817 = sst [smem:[#allocation38_spill]] %s1813_s16 }
   0x3   :  { %22 = vsyncpa [#allocation4], 0 }
   0x4   :  { %23 = vsyncpa [#allocation7], 0 }
   0x5   :  { %24 = vsyncpa [#allocation10], 0 }
   0x6   :  { %25 = vsyncpa [#allocation13], 0 }
   0x7   :  { %26 = vsyncpa [#allocation16], 0 }
   0x8   :  { %27 = vsyncpa [#allocation19], 0 }
   0x9   :  { %28 = vsyncpa [#allocation22], 0 }
   0xa   :  { %29 = vsyncpa [#allocation25], 0 }
   0xb   :  { %30 = vsyncpa [#allocation5], 0  ;;  %s1425_s21 = smov [#allocation6]   ;;  %s1055_s25 = scalar_lea.hbm %s1799_s2, 128 }
   0xc   :  { %s48_s22 = sshll.u32 %s1425_s21, 4  ;;  %p1056_p0 = scmp.ne.s32.totalorder %s1799_s2, %s1055_s25  ;;  %s49_s22 = int_to_ptr.vmem [resolvable:$true] %s48_s22 }
   0xd   :  { %p1059_p1 = scmp.lt.u32.totalorder %s1055_s25, %s1799_s2 }
   0xf   :  { %p1061_p2 = pnand %p1059_p1, %p1056_p0 }
  0x11   :  { %1064 = shalt.err (!%p1061_p2)
}
  0x12   :  { %s1065_s30 = scalar_lea.vmem %s49_s22, 128  ;;  %p1070_p4 = scmp.lt.s32.totalorder %s49_s22, %s49_s22 }
  0x13   :  { %p1066_p3 = scmp.ne.s32.totalorder %s49_s22, %s1065_s30  ;;  %p1071_p5 = scmp.lt.s32.totalorder %s1065_s30, %s1065_s30 }
  0x15   :  { %p1072_p6 = por %p1071_p5, %p1070_p4 }
  0x17   :  { %p1073_p7 = pnand %p1072_p6, %p1066_p3 }
  0x19   :  { %1076 = shalt.err (!%p1073_p7)
}
  0x1a   :  { %s1426_s0 = smov 64   ;;  %s1427_s17 = smov 4  }
  0x1b   :  { %54 = dma.hbm_to_vmem [thread:$0]  %s1799_s2, 128, %s49_s22, [#allocation7], %s1426_s0, %s1426_s0, %s1427_s17  }
  0x1c   :  { %s1428_s20 = smov [#allocation9]   ;;  %s1429_s23 = smov [#allocation12]  }
  0x1d   :  { %s72_s21 = sshll.u32 %s1428_s20, 4  ;;  %s94_s24 = sshll.u32 %s1429_s23, 4  ;;  %s73_s21 = int_to_ptr.vmem [resolvable:$true] %s72_s21  ;;  %s95_s24 = int_to_ptr.vmem [resolvable:$true] %s94_s24 }
  0x1e   :  { %s1077_s27 = scalar_lea.hbm %s1801_s4, 256 }
  0x1f   :  { %p1078_p8 = scmp.ne.s32.totalorder %s1801_s4, %s1077_s27  ;;  %p1081_p9 = scmp.lt.u32.totalorder %s1077_s27, %s1801_s4 }
  0x21   :  { %p1083_p10 = pnand %p1081_p9, %p1078_p8 }
  0x23   :  { %1086 = shalt.err (!%p1083_p10)
}
  0x24   :  { %s1087_s2 = scalar_lea.vmem %s73_s21, 256  ;;  %p1092_p12 = scmp.lt.s32.totalorder %s73_s21, %s73_s21 }
  0x25   :  { %p1088_p11 = scmp.ne.s32.totalorder %s73_s21, %s1087_s2  ;;  %p1093_p13 = scmp.lt.s32.totalorder %s1087_s2, %s1087_s2 }
  0x27   :  { %p1094_p0 = por %p1093_p13, %p1092_p12 }
  0x29   :  { %p1095_p1 = pnand %p1094_p0, %p1088_p11 }
  0x2b   :  { %1098 = shalt.err (!%p1095_p1)
}
  0x2c   :  { %78 = dma.hbm_to_vmem [thread:$0]  %s1801_s4, 256, %s73_s21, [#allocation10], %s1426_s0, %s1426_s0, %s1427_s17  }
  0x2d   :  { %s1099_s20 = scalar_lea.hbm %s1803_s6, 256 }
  0x2e   :  { %p1100_p2 = scmp.ne.s32.totalorder %s1803_s6, %s1099_s20  ;;  %p1103_p3 = scmp.lt.u32.totalorder %s1099_s20, %s1803_s6 }
  0x30   :  { %p1105_p4 = pnand %p1103_p3, %p1100_p2 }
  0x32   :  { %1108 = shalt.err (!%p1105_p4)
}
  0x33   :  { %s1109_s28 = scalar_lea.vmem %s95_s24, 256  ;;  %p1114_p6 = scmp.lt.s32.totalorder %s95_s24, %s95_s24 }
  0x34   :  { %p1110_p5 = scmp.ne.s32.totalorder %s95_s24, %s1109_s28  ;;  %p1115_p7 = scmp.lt.s32.totalorder %s1109_s28, %s1109_s28 }
  0x36   :  { %p1116_p8 = por %p1115_p7, %p1114_p6 }
  0x38   :  { %p1117_p9 = pnand %p1116_p8, %p1110_p5 }
  0x3a   :  { %1120 = shalt.err (!%p1117_p9)
}
  0x3b   :  { %100 = dma.hbm_to_vmem [thread:$0]  %s1803_s6, 256, %s95_s24, [#allocation13], %s1426_s0, %s1426_s0, %s1427_s17  }
  0x3c   :  { %s1430_s29 = smov [#allocation15]   ;;  %s1431_s2 = smov [#allocation18]  }
  0x3d   :  { %s116_s30 = sshll.u32 %s1430_s29, 4  ;;  %s138_s22 = sshll.u32 %s1431_s2, 4  ;;  %s117_s30 = int_to_ptr.vmem [resolvable:$true] %s116_s30  ;;  %s139_s22 = int_to_ptr.vmem [resolvable:$true] %s138_s22 }
  0x3e   :  { %s1121_s16 = scalar_lea.hbm %s1805_s8, 512 }
  0x3f   :  { %p1122_p10 = scmp.ne.s32.totalorder %s1805_s8, %s1121_s16  ;;  %p1125_p11 = scmp.lt.u32.totalorder %s1121_s16, %s1805_s8 }
  0x41   :  { %p1127_p12 = pnand %p1125_p11, %p1122_p10 }
  0x43   :  { %1130 = shalt.err (!%p1127_p12)
}
  0x44   :  { %s1131_s6 = scalar_lea.vmem %s117_s30, 512  ;;  %p1136_p0 = scmp.lt.s32.totalorder %s117_s30, %s117_s30 }
  0x45   :  { %p1132_p13 = scmp.ne.s32.totalorder %s117_s30, %s1131_s6  ;;  %p1137_p1 = scmp.lt.s32.totalorder %s1131_s6, %s1131_s6 }
  0x47   :  { %p1138_p2 = por %p1137_p1, %p1136_p0 }
  0x49   :  { %p1139_p3 = pnand %p1138_p2, %p1132_p13 }
  0x4b   :  { %1142 = shalt.err (!%p1139_p3)
}
  0x4c   :  { %122 = dma.hbm_to_vmem [thread:$0]  %s1805_s8, 512, %s117_s30, [#allocation16], %s1426_s0, %s1426_s0, %s1427_s17  }
  0x4d   :  { %s1143_s21 = scalar_lea.hbm %s1807_s10, 256 }
  0x4e   :  { %p1144_p4 = scmp.ne.s32.totalorder %s1807_s10, %s1143_s21  ;;  %p1147_p5 = scmp.lt.u32.totalorder %s1143_s21, %s1807_s10 }
  0x50   :  { %p1149_p6 = pnand %p1147_p5, %p1144_p4 }
  0x52   :  { %1152 = shalt.err (!%p1149_p6)
}
  0x53   :  { %s1153_s16 = scalar_lea.vmem %s139_s22, 256  ;;  %p1158_p8 = scmp.lt.s32.totalorder %s139_s22, %s139_s22 }
  0x54   :  { %p1154_p7 = scmp.ne.s32.totalorder %s139_s22, %s1153_s16  ;;  %p1159_p9 = scmp.lt.s32.totalorder %s1153_s16, %s1153_s16 }
  0x56   :  { %p1160_p10 = por %p1159_p9, %p1158_p8 }
  0x58   :  { %p1161_p11 = pnand %p1160_p10, %p1154_p7 }
  0x5a   :  { %1164 = shalt.err (!%p1161_p11)
}
  0x5b   :  { %144 = dma.hbm_to_vmem [thread:$0]  %s1807_s10, 256, %s139_s22, [#allocation19], %s1426_s0, %s1426_s0, %s1427_s17  }
  0x5c   :  { %s1432_s20 = smov [#allocation21]   ;;  %s1433_s25 = smov [#allocation24]  }
  0x5d   :  { %s160_s23 = sshll.u32 %s1432_s20, 4  ;;  %s182_s26 = sshll.u32 %s1433_s25, 4  ;;  %s161_s23 = int_to_ptr.vmem [resolvable:$true] %s160_s23  ;;  %s183_s26 = int_to_ptr.vmem [resolvable:$true] %s182_s26 }
  0x5e   :  { %s1165_s27 = scalar_lea.hbm %s1809_s12, 256 }
  0x5f   :  { %p1166_p12 = scmp.ne.s32.totalorder %s1809_s12, %s1165_s27  ;;  %p1169_p13 = scmp.lt.u32.totalorder %s1165_s27, %s1809_s12 }
  0x61   :  { %p1171_p0 = pnand %p1169_p13, %p1166_p12 }
  0x63   :  { %1174 = shalt.err (!%p1171_p0)
}
  0x64   :  { %s1175_s10 = scalar_lea.vmem %s161_s23, 256  ;;  %p1180_p2 = scmp.lt.s32.totalorder %s161_s23, %s161_s23 }
  0x65   :  { %p1176_p1 = scmp.ne.s32.totalorder %s161_s23, %s1175_s10  ;;  %p1181_p3 = scmp.lt.s32.totalorder %s1175_s10, %s1175_s10 }
  0x67   :  { %p1182_p4 = por %p1181_p3, %p1180_p2 }
  0x69   :  { %p1183_p5 = pnand %p1182_p4, %p1176_p1 }
  0x6b   :  { %1186 = shalt.err (!%p1183_p5)
}
  0x6c   :  { %166 = dma.hbm_to_vmem [thread:$0]  %s1809_s12, 256, %s161_s23, [#allocation22], %s1426_s0, %s1426_s0, %s1427_s17  }
  0x6d   :  { %s1187_s16 = scalar_lea.hbm %s1811_s14, 256 }
  0x6e   :  { %p1188_p6 = scmp.ne.s32.totalorder %s1811_s14, %s1187_s16  ;;  %p1191_p7 = scmp.lt.u32.totalorder %s1187_s16, %s1811_s14 }
  0x70   :  { %p1193_p8 = pnand %p1191_p7, %p1188_p6 }
  0x72   :  { %1196 = shalt.err (!%p1193_p8)
}
  0x73   :  { %s1197_s6 = scalar_lea.vmem %s183_s26, 256  ;;  %p1202_p10 = scmp.lt.s32.totalorder %s183_s26, %s183_s26 }
  0x74   :  { %p1198_p9 = scmp.ne.s32.totalorder %s183_s26, %s1197_s6  ;;  %p1203_p11 = scmp.lt.s32.totalorder %s1197_s6, %s1197_s6 }
  0x76   :  { %p1204_p12 = por %p1203_p11, %p1202_p10 }
  0x78   :  { %p1205_p13 = pnand %p1204_p12, %p1198_p9 }
  0x7a   :  { %1208 = shalt.err (!%p1205_p13)
}
  0x7b   :  { %188 = dma.hbm_to_vmem [thread:$0]  %s1811_s14, 256, %s183_s26, [#allocation25], %s1426_s0, %s1426_s0, %s1427_s17  }
  0x7c   :  { %s1434_s24 = smov [#allocation3]   ;;  %s1435_s28 = smov [#allocation8]  }
  0x7d   :  { %s39_s27 = sshll.u32 %s1434_s24, 4  ;;  %s60_s4 = sshll.u32 %s1435_s28, 4  ;;  %s40_s27 = int_to_ptr.vmem [resolvable:$true] %s39_s27  ;;  %s61_s4 = int_to_ptr.vmem [resolvable:$true] %s60_s4 }
  0x7e   :  { %s1209_s10 = scalar_lea.hbm %s1798_s1, 16 }
  0x7f   :  { %p1210_p0 = scmp.ne.s32.totalorder %s1798_s1, %s1209_s10  ;;  %p1213_p1 = scmp.lt.u32.totalorder %s1209_s10, %s1798_s1 }
  0x81   :  { %p1215_p2 = pnand %p1213_p1, %p1210_p0 }
  0x83   :  { %1218 = shalt.err (!%p1215_p2)
}
  0x84   :  { %s1219_s14 = scalar_lea.vmem %s40_s27, 16  ;;  %s1223_s17 = scalar_lea.vmem %s40_s27, 32 }
  0x85   :  { %p1220_p3 = scmp.ne.s32.totalorder %s40_s27, %s1219_s14  ;;  %p1224_p4 = scmp.lt.s32.totalorder %s40_s27, %s40_s27 }
  0x86   :  { %p1225_p5 = scmp.lt.s32.totalorder %s1223_s17, %s1219_s14 }
  0x88   :  { %p1226_p6 = por %p1225_p5, %p1224_p4 }
  0x8a   :  { %p1227_p7 = pnand %p1226_p6, %p1220_p3 }
  0x8c   :  { %1230 = shalt.err (!%p1227_p7)
}
  0x8d   :  { %42 = dma.hbm_to_vmem [thread:$0]  %s1798_s1, 16, %s40_s27, [#allocation4]  }
  0x8e   :  { %s1231_s20 = scalar_lea.hbm %s1800_s3, 256 }
  0x8f   :  { %p1232_p8 = scmp.ne.s32.totalorder %s1800_s3, %s1231_s20  ;;  %p1235_p9 = scmp.lt.u32.totalorder %s1231_s20, %s1800_s3 }
  0x91   :  { %p1237_p10 = pnand %p1235_p9, %p1232_p8 }
  0x93   :  { %1240 = shalt.err (!%p1237_p10)
}
  0x94   :  { %s1241_s24 = scalar_lea.vmem %s61_s4, 256  ;;  %p1246_p12 = scmp.lt.s32.totalorder %s61_s4, %s61_s4 }
  0x95   :  { %p1242_p11 = scmp.ne.s32.totalorder %s61_s4, %s1241_s24  ;;  %p1247_p13 = scmp.lt.s32.totalorder %s1241_s24, %s1241_s24 }
  0x97   :  { %p1248_p0 = por %p1247_p13, %p1246_p12 }
  0x99   :  { %p1249_p1 = pnand %p1248_p0, %p1242_p11 }
  0x9b   :  { %1252 = shalt.err (!%p1249_p1)
}
  0x9c   :  { %s1436_s1 = smov 128   ;;  %s1437_s27 = smov 8  }
  0x9d   :  { %66 = dma.hbm_to_vmem [thread:$0]  %s1800_s3, 256, %s61_s4, [#allocation7], %s1436_s1, %s1436_s1, %s1437_s27  }
  0x9e   :  { %s1438_s29 = smov [#allocation11]   ;;  %s1439_s22 = smov [#allocation14]  }
  0x9f   :  { %s85_s10 = sshll.u32 %s1438_s29, 4  ;;  %s107_s2 = sshll.u32 %s1439_s22, 4  ;;  %s86_s10 = int_to_ptr.vmem [resolvable:$true] %s85_s10  ;;  %s108_s2 = int_to_ptr.vmem [resolvable:$true] %s107_s2 }
  0xa0   :  { %s1253_s14 = scalar_lea.hbm %s1802_s5, 16 }
  0xa1   :  { %p1254_p2 = scmp.ne.s32.totalorder %s1802_s5, %s1253_s14  ;;  %p1257_p3 = scmp.lt.u32.totalorder %s1253_s14, %s1802_s5 }
  0xa3   :  { %p1259_p4 = pnand %p1257_p3, %p1254_p2 }
  0xa5   :  { %1262 = shalt.err (!%p1259_p4)
}
  0xa6   :  { %s1263_s3 = scalar_lea.vmem %s86_s10, 16  ;;  %s1267_s4 = scalar_lea.vmem %s86_s10, 32 }
  0xa7   :  { %p1264_p5 = scmp.ne.s32.totalorder %s86_s10, %s1263_s3  ;;  %p1268_p6 = scmp.lt.s32.totalorder %s86_s10, %s86_s10 }
  0xa8   :  { %p1269_p7 = scmp.lt.s32.totalorder %s1267_s4, %s1263_s3 }
  0xaa   :  { %p1270_p8 = por %p1269_p7, %p1268_p6 }
  0xac   :  { %p1271_p9 = pnand %p1270_p8, %p1264_p5 }
  0xae   :  { %1274 = shalt.err (!%p1271_p9)
}
  0xaf   :  { %88 = dma.hbm_to_vmem [thread:$0]  %s1802_s5, 16, %s86_s10, [#allocation10]  }
  0xb0   :  { %s1275_s12 = scalar_lea.hbm %s1804_s7, 16 }
  0xb1   :  { %p1276_p10 = scmp.ne.s32.totalorder %s1804_s7, %s1275_s12  ;;  %p1279_p11 = scmp.lt.u32.totalorder %s1275_s12, %s1804_s7 }
  0xb3   :  { %p1281_p12 = pnand %p1279_p11, %p1276_p10 }
  0xb5   :  { %1284 = shalt.err (!%p1281_p12)
}
  0xb6   :  { %s1285_s28 = scalar_lea.vmem %s108_s2, 16  ;;  %s1289_s21 = scalar_lea.vmem %s108_s2, 32 }
  0xb7   :  { %p1286_p13 = scmp.ne.s32.totalorder %s108_s2, %s1285_s28  ;;  %p1290_p0 = scmp.lt.s32.totalorder %s108_s2, %s108_s2 }
  0xb8   :  { %p1291_p1 = scmp.lt.s32.totalorder %s1289_s21, %s1285_s28 }
  0xba   :  { %p1292_p2 = por %p1291_p1, %p1290_p0 }
  0xbc   :  { %p1293_p3 = pnand %p1292_p2, %p1286_p13 }
  0xbe   :  { %1296 = shalt.err (!%p1293_p3)
}
  0xbf   :  { %110 = dma.hbm_to_vmem [thread:$0]  %s1804_s7, 16, %s108_s2, [#allocation13]  }
  0xc0   :  { %s1440_s10 = smov [#allocation17]   ;;  %s1441_s18 = smov [#allocation20]  }
  0xc1   :  { %s129_s22 = sshll.u32 %s1440_s10, 4  ;;  %s151_s19 = sshll.u32 %s1441_s18, 4  ;;  %s130_s22 = int_to_ptr.vmem [resolvable:$true] %s129_s22  ;;  %s152_s19 = int_to_ptr.vmem [resolvable:$true] %s151_s19 }
  0xc2   :  { %s1297_s26 = scalar_lea.hbm %s1806_s9, 64 }
  0xc3   :  { %p1298_p4 = scmp.ne.s32.totalorder %s1806_s9, %s1297_s26  ;;  %p1301_p5 = scmp.lt.u32.totalorder %s1297_s26, %s1806_s9 }
  0xc5   :  { %p1303_p6 = pnand %p1301_p5, %p1298_p4 }
  0xc7   :  { %1306 = shalt.err (!%p1303_p6)
}
  0xc8   :  { %s1307_s7 = scalar_lea.vmem %s130_s22, 64  ;;  %p1312_p8 = scmp.lt.s32.totalorder %s130_s22, %s130_s22 }
  0xc9   :  { %p1308_p7 = scmp.ne.s32.totalorder %s130_s22, %s1307_s7  ;;  %p1313_p9 = scmp.lt.s32.totalorder %s1307_s7, %s1307_s7 }
  0xcb   :  { %p1314_p10 = por %p1313_p9, %p1312_p8 }
  0xcd   :  { %p1315_p11 = pnand %p1314_p10, %p1308_p7 }
  0xcf   :  { %1318 = shalt.err (!%p1315_p11)
}
  0xd0   :  { %132 = dma.hbm_to_vmem [thread:$0]  %s1806_s9, 64, %s130_s22, [#allocation16]  }
  0xd1   :  { %s1319_s6 = scalar_lea.hbm %s1808_s11, 16 }
  0xd2   :  { %p1320_p12 = scmp.ne.s32.totalorder %s1808_s11, %s1319_s6  ;;  %p1323_p13 = scmp.lt.u32.totalorder %s1319_s6, %s1808_s11 }
  0xd4   :  { %p1325_p0 = pnand %p1323_p13, %p1320_p12 }
  0xd6   :  { %1328 = shalt.err (!%p1325_p0)
}
  0xd7   :  { %s1329_s27 = scalar_lea.vmem %s152_s19, 16  ;;  %s1333_s28 = scalar_lea.vmem %s152_s19, 32 }
  0xd8   :  { %p1330_p1 = scmp.ne.s32.totalorder %s152_s19, %s1329_s27  ;;  %p1334_p2 = scmp.lt.s32.totalorder %s152_s19, %s152_s19 }
  0xd9   :  { %p1335_p3 = scmp.lt.s32.totalorder %s1333_s28, %s1329_s27 }
  0xdb   :  { %p1336_p4 = por %p1335_p3, %p1334_p2 }
  0xdd   :  { %p1337_p5 = pnand %p1336_p4, %p1330_p1 }
  0xdf   :  { %1340 = shalt.err (!%p1337_p5)
}
  0xe0   :  { %154 = dma.hbm_to_vmem [thread:$0]  %s1808_s11, 16, %s152_s19, [#allocation19]  }
  0xe1   :  { %s1442_s5 = smov [#allocation23]   ;;  %s1443_s10 = smov [#allocation26]  }
  0xe2   :  { %s173_s29 = sshll.u32 %s1442_s5, 4  ;;  %s195_s22 = sshll.u32 %s1443_s10, 4  ;;  %s174_s29 = int_to_ptr.vmem [resolvable:$true] %s173_s29  ;;  %s196_s22 = int_to_ptr.vmem [resolvable:$true] %s195_s22 }
  0xe3   :  { %s1341_s17 = scalar_lea.hbm %s1810_s13, 16 }
  0xe4   :  { %p1342_p6 = scmp.ne.s32.totalorder %s1810_s13, %s1341_s17  ;;  %p1345_p7 = scmp.lt.u32.totalorder %s1341_s17, %s1810_s13 }
  0xe6   :  { %p1347_p8 = pnand %p1345_p7, %p1342_p6 }
  0xe8   :  { %1350 = shalt.err (!%p1347_p8)
}
  0xe9   :  { %s1351_s11 = scalar_lea.vmem %s174_s29, 16  ;;  %s1355_s19 = scalar_lea.vmem %s174_s29, 32 }
  0xea   :  { %p1352_p9 = scmp.ne.s32.totalorder %s174_s29, %s1351_s11  ;;  %p1356_p10 = scmp.lt.s32.totalorder %s174_s29, %s174_s29 }
  0xeb   :  { %p1357_p11 = scmp.lt.s32.totalorder %s1355_s19, %s1351_s11 }
  0xed   :  { %p1358_p12 = por %p1357_p11, %p1356_p10 }
  0xef   :  { %p1359_p13 = pnand %p1358_p12, %p1352_p9 }
  0xf1   :  { %1362 = shalt.err (!%p1359_p13)
}
  0xf2   :  { %176 = dma.hbm_to_vmem [thread:$0]  %s1810_s13, 16, %s174_s29, [#allocation22]  }
  0xf3   :  { %s1363_s20 = scalar_lea.hbm %s1812_s15, 16 }
  0xf4   :  { %p1364_p0 = scmp.ne.s32.totalorder %s1812_s15, %s1363_s20  ;;  %p1367_p1 = scmp.lt.u32.totalorder %s1363_s20, %s1812_s15 }
  0xf6   :  { %p1369_p2 = pnand %p1367_p1, %p1364_p0 }
  0xf8   :  { %1372 = shalt.err (!%p1369_p2)
}
  0xf9   :  { %s1373_s24 = scalar_lea.vmem %s196_s22, 16  ;;  %s1377_s1 = scalar_lea.vmem %s196_s22, 32 }
  0xfa   :  { %p1374_p3 = scmp.ne.s32.totalorder %s196_s22, %s1373_s24  ;;  %p1378_p4 = scmp.lt.s32.totalorder %s196_s22, %s196_s22 }
  0xfb   :  { %p1379_p5 = scmp.lt.s32.totalorder %s1377_s1, %s1373_s24 }
  0xfd   :  { %p1380_p6 = por %p1379_p5, %p1378_p4 }
  0xff   :  { %p1381_p7 = pnand %p1380_p6, %p1374_p3 }
 0x101   :  { %1384 = shalt.err (!%p1381_p7)
}
 0x102   :  { %198 = dma.hbm_to_vmem [thread:$0]  %s1812_s15, 16, %s196_s22, [#allocation25]  }
 0x103   :  { %1407 = dma.done.wait [#allocation4], 16  }
 0x104   :  { %1408 = vsyncadd [#allocation4], 4294967280 }
 0x105   :  { %1409 = dma.done.wait [#allocation7], 384  }
 0x106   :  { %1410 = vsyncadd [#allocation7], 4294966912 }
 0x107   :  { %1411 = dma.done.wait [#allocation10], 272  }
 0x108   :  { %1412 = vsyncadd [#allocation10], 4294967024 }
 0x109   :  { %1413 = dma.done.wait [#allocation13], 272  }
 0x10a   :  { %1414 = vsyncadd [#allocation13], 4294967024 }
 0x10b   :  { %1415 = dma.done.wait [#allocation16], 576  }
 0x10c   :  { %1416 = vsyncadd [#allocation16], 4294966720 }
 0x10d   :  { %1417 = dma.done.wait [#allocation19], 272  }
 0x10e   :  { %1418 = vsyncadd [#allocation19], 4294967024 }
 0x10f   :  { %1419 = dma.done.wait [#allocation22], 272  }
 0x110   :  { %1420 = vsyncadd [#allocation22], 4294967024 }
 0x111   :  { %1421 = dma.done.wait [#allocation25], 272  }
 0x112   :  { %1422 = vsyncadd [#allocation25], 4294967024  ;;  %v1444_v0 = vmov 0.0   ;;  %vm1445_vm0 = vmmov 0   ;;  %v1028_v1 = vld [vmem:[#allocation12] sm:$0xff]   ;;  %v1029_v2 = vld [vmem:[#allocation12 + $0x8] sm:$0xff]   ;;  %v393_v13 = vlaneseq }
 0x113   :  { %954 = vmatprep.subr.bf16.mxu1 %v1444_v0  ;;  %946 = vmatprep.subr.bf16.mxu0 %v1444_v0  ;;  %v1030_v3 = vld [vmem:[#allocation9] sm:$0xff]   ;;  %v1031_v4 = vld [vmem:[#allocation9 + $0x8] sm:$0xff]   ;;  %vm275_vm1 = vcmask 261120   ;;  %v1035_v9 = vld [vmem:[#allocation15 + $0x10] sm:$0xff]   ;;  %v1446_v11 = vmov 1966171168  }
 0x114   :  { %958 = vmatprep.mubr.msk.bf16.mxu1 %vm1445_vm0, %v1444_v0  ;;  %950 = vmatprep.mubr.msk.bf16.mxu0 %vm1445_vm0, %v1444_v0  ;;  %v321_v5 = vld [vmem:[#allocation3] sm:$0x1]  ;;  %v1032_v6 = vld [vmem:[#allocation6] sm:$0xff]   ;;  %v1036_v10 = vld [vmem:[#allocation15 + $0x18] sm:$0xff]   ;;  %v391_v12 = vunpack.c.l.s4 %v1446_v11  ;;  %v394_v15 = vshrl.u32 %v393_v13, 7  ;;  %vm476_vm2 = vcmask 523264  }
 0x115   :  { %955 = vmatpush3.bf16.msra.mxu1 %v1028_v1  ;;  %947 = vmatpush3.bf16.msra.mxu0 %v1030_v3  ;;  %v1033_v7 = vld [vmem:[#allocation15] sm:$0xff]   ;;  %v1034_v8 = vld [vmem:[#allocation15 + $0x8] sm:$0xff]   ;;  %v896_v16 = vld [vmem:[#allocation14] ss:$0 sm:$0xff]  ;;  %vm569_vm3 = vcmask 1043456   ;;  %vm525_vm4 = vcmask 64512  }
 0x116   :  { %956 = vmatprep.subr.bf16.mxu1 %v1444_v0  ;;  %948 = vmatprep.subr.bf16.mxu0 %v1444_v0  ;;  %v392_v14 = vunpack.c.0.s8 %v391_v12  ;;  %v891_v22 = vld [vmem:[#allocation11] ss:$0 sm:$0xff]  ;;  %v417_v32 = vsub.s32 0, %v394_v15  ;;  %v565_v48 = vld [vmem:[#allocation17] sm:$0xf]  ;;  %v522_v52 = vld [vmem:[#allocation8 + $0x8] sm:$0xff] }
 0x117   :  { %v571_v49 = vsel %vm569_vm3, %v565_v48, 0  ;;  %v521_v50 = vld [vmem:[#allocation8] sm:$0xff]  ;;  %s1818_s28 = sld [smem:[#allocation37_spill]]  ;;  %s1447_s21 = smov 96   ;;  %vm674_vm5 = vcmask 1041409  }
 0x118   :  { %v395_v19 = vsub.s32 %v392_v14, %v394_v15  ;;  %s1448_s10 = smov [#allocation27]  }
 0x119   :  { %957 = vmatpush3.bf16.msra.mxu1 %v1029_v2  ;;  %949 = vmatpush3.bf16.msra.mxu0 %v1031_v4  ;;  %s875_s22 = sshll.u32 %s1448_s10, 4  ;;  %s876_s22 = int_to_ptr.vmem [resolvable:$true] %s875_s22 }
 0x11a   :  { %974 = vmatprep.subr.bf16.mxu1 %v1444_v0  ;;  %962 = vmatprep.subr.bf16.mxu0 %v1444_v0  ;;  %s1385_s18 = scalar_lea.vmem %s876_s22, 32  ;;  %p1390_p9 = scmp.lt.s32.totalorder %s876_s22, %s876_s22 }
 0x11b   :  { %p1386_p8 = scmp.ne.s32.totalorder %s876_s22, %s1385_s18  ;;  %p1391_p10 = scmp.lt.s32.totalorder %s1385_s18, %s1385_s18 }
 0x11c   :  { %959 = vmatmul.mubr.msk.bf16.vlgmr.msra.gmra.mrb[0].mxu1 %vm275_vm1, %v321_v5  ;;  %951 = vmatmul.mubr.msk.bf16.vlgmr.msra.gmra.mrb[0].mxu0 %vm275_vm1, %v1032_v6 }
 0x11d   :  { %976 = vmatprep.mubr.msk.bf16.mxu1 %vm1445_vm0, %v1444_v0  ;;  %970 = vmatprep.mubr.msk.bf16.mxu0 %vm1445_vm0, %v1444_v0  ;;  %s642_s9 = ssub.f32 1.0, %s1818_s28  ;;  %p1392_p11 = por %p1391_p10, %p1390_p9 }
 0x11e   :  { %963 = vmatpush3.bf16.msra.mxu0 %v1033_v7  ;;  %975 = vmatpush3.bf16.msra.mxu1 %v571_v49 }
 0x11f   :  { %964 = vmatprep.subr.bf16.mxu0 %v1444_v0  ;;  %980 = vmatprep.subr.bf16.mxu1 %v1444_v0  ;;  %p1393_p12 = pnand %p1392_p11, %p1386_p8 }
 0x122   :  { %965 = vmatpush3.bf16.msra.mxu0 %v1034_v8 }
 0x123   :  { %966 = vmatprep.subr.bf16.mxu0 %v1444_v0 }
 0x126   :  { %967 = vmatpush3.bf16.msra.mxu0 %v1035_v9 }
 0x127   :  { %968 = vmatprep.subr.bf16.mxu0 %v1444_v0 }
 0x12a   :  { %969 = vmatpush3.bf16.msra.mxu0 %v1036_v10 }
 0x12b   :  { %988 = vmatprep.subr.bf16.mxu0 %v1444_v0 }
 0x1ef   :  { %v382_v17 = vpop.f32.mrb[0].mxu1  ;;  %v313_v23 = vpop.f32.mrb[0].mxu0 }
 0x1f0   :  { %v383_v18 = vadd.f32 %v896_v16, %v382_v17  ;;  %v960_v20 = vpop.f32.mrb[1].mxu1  ;;  %v952_v26 = vpop.f32.mrb[1].mxu0  ;;  %v314_v33 = vadd.f32 %v891_v22, %v313_v23 }
 0x1f1   :  { %v385_v21 = vpop.f32.mrb[2].mxu1  ;;  %v316_v27 = vpop.f32.mrb[2].mxu0 }
 0x1f2   :  { %v388_v24 = vpack.c.bf16 %v383_v18, %v383_v18  ;;  %v961_v25 = vpop.f32.mrb[3].mxu1  ;;  %v317_v29 = vadd.f32 %v891_v22, %v316_v27  ;;  %v953_v30 = vpop.f32.mrb[3].mxu0  ;;  %v922_v38 = vpack.c.bf16 %v314_v33, %v314_v33 }
 0x1f4   :  { %v396_v28 = vrot.slane %v388_v24, %v395_v19  ;;  %618 = vrot.lane.b32.xlu0 %v317_v29, %s1426_s0  ;;  %v923_v44 = vpack.c.bf16 %v317_v29, %v317_v29 }
 0x1f6   :  { %v403_v31 = vrot.slane %v396_v28, %v395_v19 }
 0x1f8   :  { %v405_v34 = vunpack.i.h.s16 %v403_v31  ;;  %v902_v35 = vpack.i.b16 %v403_v31, %v403_v31  ;;  %616 = vrot.lane.b32.xlu0 %v314_v33, %s1426_s0 }
 0x1fa   :  { %v414_v36 = vpack.i.b16 %v405_v34, %v405_v34  ;;  %v418_v37 = vrot.slane %v902_v35, %v417_v32 }
 0x1fc   :  { %v424_v39 = vpack.i.b16 %v418_v37, %v418_v37  ;;  %v422_v40 = vrot.slane %v414_v36, %v417_v32 }
 0x1fe   :  { %v429_v41 = vrot.slane %v424_v39, %v417_v32  ;;  %v431_v42 = vpack.i.b16 %v422_v40, %v422_v40 }
 0x200   :  { %v437_v43 = vmul.bf16 %v922_v38, %v429_v41  ;;  %v436_v45 = vrot.slane %v431_v42, %v417_v32 }
 0x202   :  { %v438_v46 = vmul.bf16 %v923_v44, %v436_v45 }
 0x204   :  { %v903_v47 = vcombine.low %v437_v43, %v438_v46 }
 0x206   :  { %971 = vmatmul.mubr.msk.bf16.vlgmr.msra.gmra.mrb[4].mxu0 %vm476_vm2, %v903_v47 }
 0x207   :  { %992 = vmatprep.mubr.msk.bf16.mxu0 %vm1445_vm0, %v1444_v0 }
 0x266   :  { %v619_v34 = vpop.permute.xlu0 %618 }
 0x26a   :  { %v617_v35 = vpop.permute.xlu0 %616 }
 0x2d9   :  { %v514_v51 = vpop.f32.mrb[4].mxu0 }
 0x2da   :  { %v523_v53 = vadd.f32 %v521_v50, %v514_v51  ;;  %v972_v54 = vpop.f32.mrb[5].mxu0  ;;  %v1037_v51 = vld [vmem:[#allocation18] sm:$0xff]  }
 0x2db   :  { %v517_v55 = vpop.f32.mrb[6].mxu0 }
 0x2dc   :  { %v526_v56 = vsel %vm525_vm4, %v523_v53, -inf  ;;  %v524_v57 = vadd.f32 %v522_v52, %v517_v55  ;;  %v973_v58 = vpop.f32.mrb[7].mxu0  ;;  %v1038_v55 = vld [vmem:[#allocation18 + $0x8] sm:$0xff]  }
 0x2dd   :  { %v527_v59 = vrot.slane %v526_v56, 4 }
 0x2de   :  { %v533_v60 = vsel %vm525_vm4, %v524_v57, -inf }
 0x2df   :  { %v528_v61 = vmax.f32 %v526_v56, %v527_v59  ;;  %v534_v62 = vrot.slane %v533_v60, 4 }
 0x2e1   :  { %v529_v63 = vrot.slane %v528_v61, 2  ;;  %v535_v1 = vmax.f32 %v533_v60, %v534_v62 }
 0x2e3   :  { %v530_v2 = vmax.f32 %v528_v61, %v529_v63  ;;  %v536_v3 = vrot.slane %v535_v1, 2  ;;  %v639_v61 = vstv %s1818_s28 }
 0x2e5   :  { %v531_v4 = vrot.slane %v530_v2, 1  ;;  %v537_v5 = vmax.f32 %v535_v1, %v536_v3 }
 0x2e7   :  { %v532_v6 = vmax.f32 %v530_v2, %v531_v4  ;;  %v538_v7 = vrot.slane %v537_v5, 1 }
 0x2e9   :  { %v540_v8 = vsub.f32 %v523_v53, %v532_v6  ;;  %v539_v9 = vmax.f32 %v537_v5, %v538_v7 }
 0x2eb   :  { %v542_v10 = vmul.f32 1.442695, %v540_v8  ;;  %v541_v11 = vsub.f32 %v524_v57, %v539_v9  ;;  %v643_v57 = vstv %s642_s9 }
 0x2ed   :  { %1043 = vpow2.f32 %v542_v10  ;;  %v544_v12 = vmul.f32 1.442695, %v541_v11 }
 0x2ef   :  { %1045 = vpow2.f32 %v544_v12  ;;  %v1039_v12 = vld [vmem:[#allocation21] sm:$0xff]  }
 0x2f0   :  { %989 = vmatpush3.bf16.msra.mxu0 %v1039_v12 }
 0x2f1   :  { %990 = vmatprep.subr.bf16.mxu0 %v1444_v0 }
 0x2f7   :  { %v1044_v13 = vpop.eup %1043 }
 0x2f8   :  { %v546_v14 = vsel %vm525_vm4, %v1044_v13, 0.0 }
 0x2f9   :  { %v1046_v15 = vpop.eup %1045  ;;  %v547_v16 = vrot.slane %v546_v14, 4 }
 0x2fa   :  { %v553_v17 = vsel %vm525_vm4, %v1046_v15, 0.0 }
 0x2fb   :  { %v548_v18 = vadd.f32 %v547_v16, %v546_v14  ;;  %v554_v19 = vrot.slane %v553_v17, 4  ;;  %v910_v14 = vld [vmem:[#allocation20] ss:$0 sm:$0xff] }
 0x2fd   :  { %v549_v20 = vrot.slane %v548_v18, 2  ;;  %v555_v21 = vadd.f32 %v554_v19, %v553_v17 }
 0x2ff   :  { %v550_v22 = vadd.f32 %v549_v20, %v548_v18  ;;  %v556_v23 = vrot.slane %v555_v21, 2 }
 0x301   :  { %v551_v24 = vrot.slane %v550_v22, 1  ;;  %v557_v25 = vadd.f32 %v556_v23, %v555_v21  ;;  %v1042_v23 = vld [vmem:[#allocation24 + $0x8] sm:$0xff]  }
 0x303   :  { %v552_v26 = vadd.f32 %v551_v24, %v550_v22  ;;  %v558_v27 = vrot.slane %v557_v25, 1  ;;  %v1041_v22 = vld [vmem:[#allocation24] sm:$0xff]   ;;  %v914_v24 = vld [vmem:[#allocation23] ss:$0 sm:$0xff] }
 0x305   :  { %1047 = vrcp.f32 %v552_v26  ;;  %v559_v28 = vadd.f32 %v558_v27, %v557_v25 }
 0x307   :  { %1049 = vrcp.f32 %v559_v28 }
 0x30f   :  { %v1048_v29 = vpop.eup %1047 }
 0x310   :  { %v562_v31 = vmul.f32 %v1048_v29, %v1044_v13  ;;  %v1040_v13 = vld [vmem:[#allocation21 + $0x8] sm:$0xff]  }
 0x311   :  { %v1050_v30 = vpop.eup %1049  ;;  %991 = vmatpush3.bf16.msra.mxu0 %v1040_v13 }
 0x312   :  { %v563_v32 = vmul.f32 %v1050_v30, %v1046_v15 }
 0x314   :  { %v564_v33 = vpack.c.bf16 %v563_v32, %v562_v31  ;;  %v918_v32 = vld [vmem:[#allocation26] ss:$0 sm:$0xff] }
 0x316   :  { %977 = vmatmul.mubr.msk.bf16.vlgmr.msra.gmra.mrb[4].mxu1 %vm525_vm4, %v564_v33 }
 0x317   :  { %984 = vmatprep.mubr.msk.bf16.mxu1 %vm1445_vm0, %v1444_v0  ;;  %981 = vmatpush3.bf16.msra.mxu1 %v1037_v51 }
 0x318   :  { %982 = vmatprep.subr.bf16.mxu1 %v1444_v0 }
 0x31b   :  { %983 = vmatpush3.bf16.msra.mxu1 %v1038_v55 }
 0x31c   :  { %996 = vmatprep.subr.bf16.mxu1 %v1444_v0 }
 0x3e9   :  { %v607_v36 = vpop.f32.mrb[4].mxu1 }
 0x3ea   :  { %v622_v37 = vmul.f32 %v617_v35, %v607_v36  ;;  %v978_v38 = vpop.f32.mrb[5].mxu1 }
 0x3eb   :  { %v610_v39 = vpop.f32.mrb[6].mxu1 }
 0x3ec   :  { %v624_v40 = vsel %vm476_vm2, %v622_v37, 0.0  ;;  %v623_v41 = vmul.f32 %v619_v34, %v610_v39  ;;  %v979_v42 = vpop.f32.mrb[7].mxu1 }
 0x3ed   :  { %v625_v43 = vrot.slane %v624_v40, 4 }
 0x3ee   :  { %v631_v44 = vsel %vm476_vm2, %v623_v41, 0.0 }
 0x3ef   :  { %v626_v45 = vadd.f32 %v625_v43, %v624_v40  ;;  %v632_v46 = vrot.slane %v631_v44, 4 }
 0x3f1   :  { %v627_v47 = vrot.slane %v626_v45, 2  ;;  %v633_v48 = vadd.f32 %v632_v46, %v631_v44 }
 0x3f3   :  { %v628_v49 = vadd.f32 %v627_v47, %v626_v45  ;;  %v634_v50 = vrot.slane %v633_v48, 2 }
 0x3f5   :  { %v635_v52 = vadd.f32 %v634_v50, %v633_v48  ;;  %v629_v53 = vrot.slane %v628_v49, 1 }
 0x3f7   :  { %v636_v54 = vrot.slane %v635_v52, 1  ;;  %v630_v58 = vadd.f32 %v629_v53, %v628_v49 }
 0x3f9   :  { %v637_v56 = vadd.f32 %v636_v54, %v635_v52  ;;  %v644_v60 = vmul.f32 %v643_v57, %v630_v58  ;;  %v640_v3 = vmul.f32 %v639_v61, %v630_v58 }
 0x3fb   :  { %v645_v59 = vmul.f32 %v643_v57, %v637_v56  ;;  %v641_v62 = vmul.f32 %v639_v61, %v637_v56 }
 0x3fd   :  { %650 = vrot.lane.b32.xlu1 %v645_v59, %s1447_s21 }
 0x401   :  { %648 = vrot.lane.b32.xlu1 %v644_v60, %s1447_s21 }
 0x46f   :  { %v651_v63 = vpop.permute.xlu1 %650 }
 0x470   :  { %v655_v1 = vadd.f32 %v651_v63, %v641_v62 }
 0x472   :  { %v657_v2 = vpack.c.bf16 %v655_v1, %v655_v1 }
 0x473   :  { %v649_v4 = vpop.permute.xlu1 %648 }
 0x474   :  { %v672_v5 = vunpack.c.l.b16 %v657_v2  ;;  %v654_v6 = vadd.f32 %v649_v4, %v640_v3 }
 0x476   :  { %v656_v7 = vpack.c.bf16 %v654_v6, %v654_v6  ;;  %v673_v8 = vrot.slane %v672_v5, 7 }
 0x478   :  { %v671_v9 = vunpack.c.l.b16 %v656_v7 }
 0x47a   :  { %v675_v10 = vsel %vm674_vm5, %v673_v8, %v671_v9 }
 0x47b   :  { %v676_v11 = vpack.c.b16 %v675_v10, %v675_v10 }
 0x47d   :  { %985 = vmatmul.mubr.msk.bf16.vlgmr.msra.gmra.mrb[8].mxu1 %vm275_vm1, %v676_v11 }
 0x47e   :  { %1000 = vmatprep.mubr.msk.bf16.mxu1 %vm1445_vm0, %v1444_v0  ;;  %997 = vmatpush3.bf16.msra.mxu1 %v1041_v22 }
 0x47f   :  { %998 = vmatprep.subr.bf16.mxu1 %v1444_v0 }
 0x482   :  { %999 = vmatpush3.bf16.msra.mxu1 %v1042_v23 }
 0x550   :  { %v726_v15 = vpop.f32.mrb[8].mxu1 }
 0x551   :  { %v727_v16 = vadd.f32 %v910_v14, %v726_v15  ;;  %v986_v17 = vpop.f32.mrb[9].mxu1 }
 0x552   :  { %v729_v18 = vpop.f32.mrb[10].mxu1 }
 0x553   :  { %1051 = vtanh.f32 %v727_v16  ;;  %v987_v19 = vpop.f32.mrb[11].mxu1 }
 0x55d   :  { %v1052_v20 = vpop.eup %1051 }
 0x55e   :  { %v733_v21 = vpack.c.bf16 %v1052_v20, %v1052_v20 }
 0x560   :  { %993 = vmatmul.mubr.msk.bf16.vlgmr.msra.gmra.mrb[8].mxu0 %vm275_vm1, %v733_v21 }
 0x633   :  { %v794_v25 = vpop.f32.mrb[8].mxu0 }
 0x634   :  { %v795_v26 = vadd.f32 %v914_v24, %v794_v25  ;;  %v994_v27 = vpop.f32.mrb[9].mxu0 }
 0x635   :  { %v797_v28 = vpop.f32.mrb[10].mxu0 }
 0x636   :  { %1053 = vtanh.f32 %v795_v26  ;;  %v995_v29 = vpop.f32.mrb[11].mxu0 }
 0x640   :  { %v1054_v30 = vpop.eup %1053 }
 0x641   :  { %v801_v31 = vpack.c.bf16 %v1054_v30, %v1054_v30 }
 0x643   :  { %1001 = vmatmul.mubr.msk.bf16.vlgmr.msra.gmra.mrb[12].mxu1 %vm275_vm1, %v801_v31 }
 0x716   :  { %v862_v33 = vpop.f32.mrb[12].mxu1 }
 0x717   :  { %v863_v34 = vadd.f32 %v918_v32, %v862_v33  ;;  %v1002_v35 = vpop.f32.mrb[13].mxu1 }
 0x718   :  { %v865_v0 = vpop.f32.mrb[14].mxu1 }
 0x719   :  { %868 = vst [vmem:[#allocation27] sm:$0x3] %v863_v34  ;;  %v1003_v36 = vpop.f32.mrb[15].mxu1 }
 0x71a   :  { %1396 = shalt.err (!%p1393_p12)
}
 0x71b   :  { %s1819_s26 = sld [smem:[#allocation38_spill]] }
 0x721   :  { %s1397_s16 = scalar_lea.hbm %s1819_s26, 32 }
 0x722   :  { %p1398_p13 = scmp.ne.s32.totalorder %s1819_s26, %s1397_s16  ;;  %p1401_p0 = scmp.lt.u32.totalorder %s1397_s16, %s1819_s26 }
 0x724   :  { %p1403_p1 = pnand %p1401_p0, %p1398_p13 }
 0x726   :  { %1406 = shalt.err (!%p1403_p1)
}
 0x727   :  { %878 = dma.vmem_to_hbm [thread:$0]  %s876_s22, 32, %s1819_s26, [#allocation5]  }
 0x728   :  { %1423 = dma.done.wait [#allocation5], 32  }
 0x729   :  { %1424 = vsyncadd [#allocation5], 4294967264 }
 0x72a   :  { %882 = vsyncpa [#allocation4], 1 }
 0x72b   :  { %883 = vsyncpa [#allocation7], 1 }
 0x72c   :  { %884 = vsyncpa [#allocation10], 1 }
 0x72d   :  { %885 = vsyncpa [#allocation13], 1 }
 0x72e   :  { %886 = vsyncpa [#allocation16], 1 }
 0x72f   :  { %887 = vsyncpa [#allocation19], 1 }
 0x730   :  { %888 = vsyncpa [#allocation22], 1 }
 0x731   :  { %889 = vsyncpa [#allocation25], 1 }
 0x732   :  { %890 = vsyncpa [#allocation5], 1 }

</bundles_post_ra>
